<compile_context>
chip_gen: v5e
topology: v5e:2x2
jax: 0.10.0
libtpu: 0.0.40
codegen_flags: <defaults>
</compile_context>

<pallas_src>
import jax
import jax.numpy as jnp
from jax.experimental import pallas as pl
from jax.experimental.pallas import tpu as pltpu

IN_DIM, H1, H2, OUT_DIM = 28 * 28, 256, 128, 10
OUT_PAD = 128           # lane-dense padded logits width (unmasked vst)
MAX_TILE_B = 2048       # bf16 x tile of 2048x784 keeps total VMEM ~13 MB (all gens OK)


def mlp_kernel(x_ref, w1_ref, b1_ref, w2_ref, b2_ref, w3_ref, b3_ref, o_ref):
    # fcn1 + ReLU: x arrives bf16, weights bf16 -> MXU, f32 accumulate, f32 elementwise.
    h = jnp.dot(x_ref[...], w1_ref[...], preferred_element_type=jnp.float32)
    h = jnp.maximum(h + b1_ref[...], 0.0)
    # fcn2 + ReLU
    h = jnp.dot(h.astype(jnp.bfloat16), w2_ref[...], preferred_element_type=jnp.float32)
    h = jnp.maximum(h + b2_ref[...], 0.0)
    # fcn3 (logits, no activation); padded to 128 lanes, stored bf16 to halve writeback.
    h = jnp.dot(h.astype(jnp.bfloat16), w3_ref[...], preferred_element_type=jnp.float32)
    o_ref[...] = (h + b3_ref[...]).astype(o_ref.dtype)


def _choose_tile_b(B: int) -> int:
    """Pick the batch tile.

    Large tiles amortize per-grid-step overhead (~0.35us); cap at MAX_TILE_B so the
    double-buffered bf16 x tile + resident weights + intermediates stay within the
    default/raised scoped-VMEM budget on v5e/v6e/v7x. For large batches, aim for
    >= 2 grid steps so the 'parallel' axis can shard across v7x's two TensorCores.
    """
    if B <= 512:
        # Single tile, minimal batch padding (sublane-aligned).
        return max(8, ((B + 7) // 8) * 8)
    half = (B + 1) // 2
    return min(MAX_TILE_B, ((half + 255) // 256) * 256)


@jax.jit
def fcn_forward(x, params):
    """x: (B, 784) float (f32 or bf16). Returns (B, 10) f32 logits.

    For peak throughput, supply x already in bf16 (or call this under jit from the
    producer so the f32->bf16 convert fuses with the upstream op); the bf16 x stream
    is what the kernel's HBM bandwidth budget is sized for.
    """
    w1, b1, w2, b2, w3, b3 = params  # weights (in, out) bf16; b3/w3 padded to OUT_PAD
    B = x.shape[0]
    tile_b = _choose_tile_b(B)
    n_tiles = pl.cdiv(B, tile_b)
    B_pad = n_tiles * tile_b

    x = x.astype(jnp.bfloat16)
    if B_pad != B:
        x = jnp.pad(x, ((0, B_pad - B), (0, 0)))

    out = pl.pallas_call(
        mlp_kernel,
        out_shape=jax.ShapeDtypeStruct((B_pad, OUT_PAD), jnp.bfloat16),
        grid=(n_tiles,),
        in_specs=[
            pl.BlockSpec((tile_b, IN_DIM), lambda i: (i, 0)),   # x tile, pipelined
            pl.BlockSpec((IN_DIM, H1),     lambda i: (0, 0)),   # weights: constant index
            pl.BlockSpec((1, H1),          lambda i: (0, 0)),   #   -> DMA'd once,
            pl.BlockSpec((H1, H2),         lambda i: (0, 0)),   #      VMEM-resident
            pl.BlockSpec((1, H2),          lambda i: (0, 0)),
            pl.BlockSpec((H2, OUT_PAD),    lambda i: (0, 0)),
            pl.BlockSpec((1, OUT_PAD),     lambda i: (0, 0)),
        ],
        out_specs=pl.BlockSpec((tile_b, OUT_PAD), lambda i: (i, 0)),
        compiler_params=pltpu.CompilerParams(
            dimension_semantics=("parallel",),       # shard batch tiles across v7x TCs
            vmem_limit_bytes=32 * 1024 * 1024,       # headroom for 2048-row tiles on v5e
        ),
    )(x, w1, b1, w2, b2, w3, b3)

    # Strip batch/lane padding; tiny (B, 10) slab, returned as f32 logits.
    return out[:B, :OUT_DIM].astype(jnp.float32)


def init_params(key):
    """Deterministic PyTorch-style (uniform +/- 1/sqrt(fan_in)) init.

    Weights stored as (in, out) in bf16 (MXU-native); biases kept f32 (elementwise path
    stays f32). Layer 3 is zero-padded from 10 to OUT_PAD output columns so the kernel's
    output store is lane-dense; padded logit lanes are exactly 0 and get sliced off.
    """
    def linear(key, fan_in, fan_out, pad_to=None):
        kw, kb = jax.random.split(key)
        bound = 1.0 / jnp.sqrt(fan_in)
        w = jax.random.uniform(kw, (fan_in, fan_out), jnp.float32, -bound, bound)
        b = jax.random.uniform(kb, (1, fan_out), jnp.float32, -bound, bound)
        if pad_to is not None and pad_to > fan_out:
            w = jnp.pad(w, ((0, 0), (0, pad_to - fan_out)))
            b = jnp.pad(b, ((0, 0), (0, pad_to - fan_out)))
        return w.astype(jnp.bfloat16), b

    k1, k2, k3 = jax.random.split(key, 3)
    w1, b1 = linear(k1, IN_DIM, H1)
    w2, b2 = linear(k2, H1, H2)
    w3, b3 = linear(k3, H2, OUT_DIM, pad_to=OUT_PAD)
    return w1, b1, w2, b2, w3, b3


def reference_forward(x, params):
    """Pure-JAX reference with identical bf16-operand / f32-accumulate / bf16-store math."""
    w1, b1, w2, b2, w3, b3 = params
    h = jnp.dot(x.astype(jnp.bfloat16), w1, preferred_element_type=jnp.float32)
    h = jnp.maximum(h + b1, 0.0)
    h = jnp.dot(h.astype(jnp.bfloat16), w2, preferred_element_type=jnp.float32)
    h = jnp.maximum(h + b2, 0.0)
    h = jnp.dot(h.astype(jnp.bfloat16), w3, preferred_element_type=jnp.float32)
    h = (h + b3).astype(jnp.bfloat16)
    return h[:, :OUT_DIM].astype(jnp.float32)


if __name__ == "__main__":
    key = jax.random.PRNGKey(0)
    kx, kp = jax.random.split(key)
    B = 8  # small test batch; wrapper picks an 8-row tile, no wasted padding
    x = jax.random.normal(kx, (B, IN_DIM), jnp.float32)
    params = init_params(kp)

    out = jax.block_until_ready(fcn_forward(x, params))
    ref = jax.block_until_ready(reference_forward(x, params))

    assert out.shape == (B, OUT_DIM)
    max_err = jnp.max(jnp.abs(out - ref))
    assert jnp.allclose(out, ref, atol=2e-2, rtol=2e-2), f"max abs err = {max_err}"
    print("KERNEL_OK")
</pallas_src>

<mosaic_0001>
module attributes {stable_mosaic.version = 11 : i64} {
  func.func @mlp_kernel(%arg0: i32, %arg1: memref<8x784xbf16, #tpu.memory_space<vmem>>, %arg2: memref<784x256xbf16, #tpu.memory_space<vmem>>, %arg3: memref<1x256xf32, #tpu.memory_space<vmem>>, %arg4: memref<256x128xbf16, #tpu.memory_space<vmem>>, %arg5: memref<1x128xf32, #tpu.memory_space<vmem>>, %arg6: memref<128x128xbf16, #tpu.memory_space<vmem>>, %arg7: memref<1x128xf32, #tpu.memory_space<vmem>>, %arg8: memref<8x128xbf16, #tpu.memory_space<vmem>>) attributes {dimension_semantics = [#tpu.dimension_semantics<parallel>], iteration_bounds = array<i64: 1>, scalar_prefetch = 0 : i64, scratch_operands = 0 : i64, tpu.core_type = #tpu.core_type<tc>, window_params = [{transform_indices = @transform_0, window_bounds = array<i64: 8, 784>}, {pipeline_mode = #tpu.pipeline_mode<synchronous>, transform_indices = @transform_1, window_bounds = array<i64: 784, 256>}, {pipeline_mode = #tpu.pipeline_mode<synchronous>, transform_indices = @transform_2, window_bounds = array<i64: 1, 256>}, {pipeline_mode = #tpu.pipeline_mode<synchronous>, transform_indices = @transform_3, window_bounds = array<i64: 256, 128>}, {pipeline_mode = #tpu.pipeline_mode<synchronous>, transform_indices = @transform_4, window_bounds = array<i64: 1, 128>}, {pipeline_mode = #tpu.pipeline_mode<synchronous>, transform_indices = @transform_5, window_bounds = array<i64: 128, 128>}, {pipeline_mode = #tpu.pipeline_mode<synchronous>, transform_indices = @transform_6, window_bounds = array<i64: 1, 128>}, {transform_indices = @transform_7, window_bounds = array<i64: 8, 128>}]} {
    %c0 = arith.constant 0 : index
    %c0_0 = arith.constant 0 : index
    %0 = vector.load %arg1[%c0, %c0_0] : memref<8x784xbf16, #tpu.memory_space<vmem>>, vector<8x784xbf16>
    %c0_1 = arith.constant 0 : index
    %c0_2 = arith.constant 0 : index
    %1 = vector.load %arg2[%c0_1, %c0_2] : memref<784x256xbf16, #tpu.memory_space<vmem>>, vector<784x256xbf16>
    %cst = arith.constant dense<0.000000e+00> : vector<8x256xf32>
    %2 = tpu.matmul %0, %1, %cst {dimension_numbers = #tpu.dot_dimension_numbers<[1], [0], [0], [1], [0, 0, 1, 1], [], []>} : vector<8x784xbf16>, vector<784x256xbf16>, vector<8x256xf32> -> vector<8x256xf32>
    %c0_3 = arith.constant 0 : index
    %c0_4 = arith.constant 0 : index
    %3 = vector.load %arg3[%c0_3, %c0_4] : memref<1x256xf32, #tpu.memory_space<vmem>>, vector<1x256xf32>
    %4 = vector.broadcast %3 : vector<1x256xf32> to vector<8x256xf32>
    %5 = arith.addf %2, %4 : vector<8x256xf32>
    %cst_5 = arith.constant 0.000000e+00 : f32
    %6 = vector.broadcast %cst_5 : f32 to vector<8x256xf32>
    %7 = arith.maximumf %5, %6 : vector<8x256xf32>
    %8 = arith.truncf %7 : vector<8x256xf32> to vector<8x256xbf16>
    %c0_6 = arith.constant 0 : index
    %c0_7 = arith.constant 0 : index
    %9 = vector.load %arg4[%c0_6, %c0_7] : memref<256x128xbf16, #tpu.memory_space<vmem>>, vector<256x128xbf16>
    %cst_8 = arith.constant dense<0.000000e+00> : vector<8x128xf32>
    %10 = tpu.matmul %8, %9, %cst_8 {dimension_numbers = #tpu.dot_dimension_numbers<[1], [0], [0], [1], [0, 0, 1, 1], [], []>} : vector<8x256xbf16>, vector<256x128xbf16>, vector<8x128xf32> -> vector<8x128xf32>
    %c0_9 = arith.constant 0 : index
    %c0_10 = arith.constant 0 : index
    %11 = vector.load %arg5[%c0_9, %c0_10] : memref<1x128xf32, #tpu.memory_space<vmem>>, vector<1x128xf32>
    %12 = vector.broadcast %11 : vector<1x128xf32> to vector<8x128xf32>
    %13 = arith.addf %10, %12 : vector<8x128xf32>
    %cst_11 = arith.constant 0.000000e+00 : f32
    %14 = vector.broadcast %cst_11 : f32 to vector<8x128xf32>
    %15 = arith.maximumf %13, %14 : vector<8x128xf32>
    %16 = arith.truncf %15 : vector<8x128xf32> to vector<8x128xbf16>
    %c0_12 = arith.constant 0 : index
    %c0_13 = arith.constant 0 : index
    %17 = vector.load %arg6[%c0_12, %c0_13] : memref<128x128xbf16, #tpu.memory_space<vmem>>, vector<128x128xbf16>
    %cst_14 = arith.constant dense<0.000000e+00> : vector<8x128xf32>
    %18 = tpu.matmul %16, %17, %cst_14 {dimension_numbers = #tpu.dot_dimension_numbers<[1], [0], [0], [1], [0, 0, 1, 1], [], []>} : vector<8x128xbf16>, vector<128x128xbf16>, vector<8x128xf32> -> vector<8x128xf32>
    %c0_15 = arith.constant 0 : index
    %c0_16 = arith.constant 0 : index
    %19 = vector.load %arg7[%c0_15, %c0_16] : memref<1x128xf32, #tpu.memory_space<vmem>>, vector<1x128xf32>
    %20 = vector.broadcast %19 : vector<1x128xf32> to vector<8x128xf32>
    %21 = arith.addf %18, %20 : vector<8x128xf32>
    %22 = arith.truncf %21 : vector<8x128xf32> to vector<8x128xbf16>
    %c0_17 = arith.constant 0 : index
    %c0_18 = arith.constant 0 : index
    %23 = vector.load %arg8[%c0_17, %c0_18] : memref<8x128xbf16, #tpu.memory_space<vmem>>, vector<8x128xbf16>
    tpu.vector_store %arg8[%c0_17, %c0_18], %22 {strides = array<i32>} : memref<8x128xbf16, #tpu.memory_space<vmem>>, vector<8x128xbf16>,
    return
  }
  func.func @transform_0(%arg0: i32) -> (i32, i32) {
    %c0_i32 = arith.constant 0 : i32
    %c0_i32_0 = arith.constant 0 : i32
    return %arg0, %c0_i32 : i32, i32
  }
  func.func @transform_1(%arg0: i32) -> (i32, i32) {
    %c0_i32 = arith.constant 0 : i32
    %c0_i32_0 = arith.constant 0 : i32
    %c0_i32_1 = arith.constant 0 : i32
    return %c0_i32, %c0_i32_0 : i32, i32
  }
  func.func @transform_2(%arg0: i32) -> (i32, i32) {
    %c0_i32 = arith.constant 0 : i32
    %c0_i32_0 = arith.constant 0 : i32
    %c0_i32_1 = arith.constant 0 : i32
    return %c0_i32, %c0_i32_0 : i32, i32
  }
  func.func @transform_3(%arg0: i32) -> (i32, i32) {
    %c0_i32 = arith.constant 0 : i32
    %c0_i32_0 = arith.constant 0 : i32
    %c0_i32_1 = arith.constant 0 : i32
    return %c0_i32, %c0_i32_0 : i32, i32
  }
  func.func @transform_4(%arg0: i32) -> (i32, i32) {
    %c0_i32 = arith.constant 0 : i32
    %c0_i32_0 = arith.constant 0 : i32
    %c0_i32_1 = arith.constant 0 : i32
    return %c0_i32, %c0_i32_0 : i32, i32
  }
  func.func @transform_5(%arg0: i32) -> (i32, i32) {
    %c0_i32 = arith.constant 0 : i32
    %c0_i32_0 = arith.constant 0 : i32
    %c0_i32_1 = arith.constant 0 : i32
    return %c0_i32, %c0_i32_0 : i32, i32
  }
  func.func @transform_6(%arg0: i32) -> (i32, i32) {
    %c0_i32 = arith.constant 0 : i32
    %c0_i32_0 = arith.constant 0 : i32
    %c0_i32_1 = arith.constant 0 : i32
    return %c0_i32, %c0_i32_0 : i32, i32
  }
  func.func @transform_7(%arg0: i32) -> (i32, i32) {
    %c0_i32 = arith.constant 0 : i32
    %c0_i32_0 = arith.constant 0 : i32
    return %arg0, %c0_i32 : i32, i32
  }
}

</mosaic_0001>

<bundles_post_ra>
// kernel: fcn_forward.1
= control target key start
LH: loop header
LB: loop body
LE: loop exit
PB: predicated region body
PF: predicated region fallthrough
CT: control target
= control target key end

     0   :  { %12 = vsyncpa [#allocation3], 0  ;;  %s1922_s0 = inlined_call_operand.vmem [shape: bf16[8,784], index: 0, kind: input, shape index: {}]   ;;  %s1923_s1 = inlined_call_operand.hbm [shape: bf16[784,256], index: 1, kind: input, shape index: {}]   ;;  %s1924_s2 = inlined_call_operand.vmem [shape: f32[1,256], index: 2, kind: input, shape index: {}]   ;;  %s1925_s3 = inlined_call_operand.hbm [shape: bf16[256,128], index: 3, kind: input, shape index: {}]   ;;  %s1926_s4 = inlined_call_operand.vmem [shape: f32[1,128], index: 4, kind: input, shape index: {}]   ;;  %s1927_s5 = inlined_call_operand.vmem [shape: bf16[128,128], index: 5, kind: input, shape index: {}]   ;;  %s1928_s6 = inlined_call_operand.vmem [shape: f32[1,128], index: 6, kind: input, shape index: {}]   ;;  %s1929_s7 = inlined_call_operand.vmem [shape: bf16[8,128], index: 7, kind: output, shape index: {}]  }
   0x1   :  { %s20_s26 = sshll.u32 %s1923_s1, 4  ;;  %s21_s26 = int_to_ptr.hbm [resolvable:$true] %s20_s26 }
   0x2   :  { %13 = vsyncpa [#allocation5], 0  ;;  %s1792_s27 = smov [#allocation2]   ;;  %s35_s8 = sshll.u32 %s1925_s3, 4  ;;  %s36_s8 = int_to_ptr.hbm [resolvable:$true] %s35_s8 }
   0x3   :  { %s22_s28 = sshll.u32 %s1792_s27, 4  ;;  %s1793_s9 = smov 128   ;;  %s23_s28 = int_to_ptr.vmem [resolvable:$true] %s22_s28 }
   0x4   :  { %s1794_s10 = smov 8   ;;  %s1795_s11 = smov [#allocation4]  }
   0x5   :  { %28 = dma.hbm_to_vmem [thread:$0]  %s21_s26, 12544, %s23_s28, [#allocation3], %s1793_s9, %s1793_s9, %s1794_s10  }
   0x6   :  { %s37_s12 = sshll.u32 %s1795_s11, 4  ;;  %s1796_s13 = smov 64   ;;  %s38_s12 = int_to_ptr.vmem [resolvable:$true] %s37_s12 }
   0x7   :  { %s1797_s14 = smov 4  }
   0x8   :  { %43 = dma.hbm_to_vmem [thread:$0]  %s36_s8, 2048, %s38_s12, [#allocation5], %s1796_s13, %s1796_s13, %s1797_s14  }
   0x9   :  { %1788 = dma.done.wait [#allocation3], 12544  }
   0xa   :  { %1789 = vsyncadd [#allocation3], 4294954752 }
   0xb   :  { %1790 = dma.done.wait [#allocation5], 2048  }
   0xc   :  { %1791 = vsyncadd [#allocation5], 4294965248  ;;  %v1178_v0 = vld [vmem:[#allocation2 + $0x70] sm:$0xf]  ;;  %v1625_v1 = vld [vmem:[#allocation2 + $0x74] sm:$0xf0] }
   0xd   :  { %v1306_v2 = vld [vmem:[#allocation2 + $0x170] sm:$0xf]  ;;  %v1179_v3 = vor.u32 %v1625_v1, %v1178_v0  ;;  %v1657_v4 = vld [vmem:[#allocation2 + $0x174] sm:$0xf0]  ;;  %v1170_v11 = vld [vmem:[#allocation2 + $0x60] sm:$0xf] }
   0xe   :  { %v1370_v5 = vld [vmem:[#allocation2 + $0x1f0] sm:$0xf]  ;;  %v1673_v6 = vld [vmem:[#allocation2 + $0x1f4] sm:$0xf0]  ;;  %v1307_v7 = vor.u32 %v1657_v4, %v1306_v2  ;;  %v1623_v13 = vld [vmem:[#allocation2 + $0x64] sm:$0xf0] }
   0xf   :  { %v1371_v8 = vor.u32 %v1673_v6, %v1370_v5  ;;  %v1242_v9 = vld [vmem:[#allocation2 + $0xf0] sm:$0xf]  ;;  %v1641_v10 = vld [vmem:[#allocation2 + $0xf4] sm:$0xf0]  ;;  %685 = vmatpush.bf16.msra.mxu0 %v1179_v3  ;;  %v1298_v14 = vld [vmem:[#allocation2 + $0x160] sm:$0xf]  ;;  %v1171_v16 = vor.u32 %v1623_v13, %v1170_v11 }
  0x10   :  { %v1243_v12 = vor.u32 %v1641_v10, %v1242_v9  ;;  %v1655_v15 = vld [vmem:[#allocation2 + $0x164] sm:$0xf0]  ;;  %711 = vmatpush.bf16.msra.mxu2 %v1307_v7  ;;  %v1362_v18 = vld [vmem:[#allocation2 + $0x1e0] sm:$0xf]  ;;  %v1162_v23 = vld [vmem:[#allocation2 + $0x50] sm:$0xf] }
  0x11   :  { %724 = vmatpush.bf16.msra.mxu3 %v1371_v8  ;;  %v1299_v17 = vor.u32 %v1655_v15, %v1298_v14  ;;  %v1671_v19 = vld [vmem:[#allocation2 + $0x1e4] sm:$0xf0]  ;;  %v1234_v20 = vld [vmem:[#allocation2 + $0xe0] sm:$0xf]  ;;  %v1621_v24 = vld [vmem:[#allocation2 + $0x54] sm:$0xf0] }
  0x12   :  { %698 = vmatpush.bf16.msra.mxu1 %v1243_v12  ;;  %v1363_v21 = vor.u32 %v1671_v19, %v1362_v18  ;;  %v1639_v22 = vld [vmem:[#allocation2 + $0xe4] sm:$0xf0]  ;;  %v1290_v26 = vld [vmem:[#allocation2 + $0x150] sm:$0xf]  ;;  %v1653_v27 = vld [vmem:[#allocation2 + $0x154] sm:$0xf0]  ;;  %v1163_v29 = vor.u32 %v1621_v24, %v1162_v23 }
  0x13   :  { %v1235_v25 = vor.u32 %v1639_v22, %v1234_v20  ;;  %v1354_v28 = vld [vmem:[#allocation2 + $0x1d0] sm:$0xf]  ;;  %686 = vmatpush.bf16.msra.mxu0 %v1171_v16  ;;  %v1669_v30 = vld [vmem:[#allocation2 + $0x1d4] sm:$0xf0]  ;;  %v1291_v33 = vor.u32 %v1653_v27, %v1290_v26  ;;  %v1154_v35 = vld [vmem:[#allocation2 + $0x40] sm:$0xf] }
  0x14   :  { %v1226_v31 = vld [vmem:[#allocation2 + $0xd0] sm:$0xf]  ;;  %v1637_v32 = vld [vmem:[#allocation2 + $0xd4] sm:$0xf0]  ;;  %712 = vmatpush.bf16.msra.mxu2 %v1299_v17  ;;  %v1355_v34 = vor.u32 %v1669_v30, %v1354_v28  ;;  %v1619_v36 = vld [vmem:[#allocation2 + $0x44] sm:$0xf0] }
  0x15   :  { %725 = vmatpush.bf16.msra.mxu3 %v1363_v21  ;;  %v1282_v37 = vld [vmem:[#allocation2 + $0x140] sm:$0xf]  ;;  %v1227_v38 = vor.u32 %v1637_v32, %v1226_v31  ;;  %v1651_v39 = vld [vmem:[#allocation2 + $0x144] sm:$0xf0]  ;;  %v1155_v44 = vor.u32 %v1619_v36, %v1154_v35  ;;  %v1146_v47 = vld [vmem:[#allocation2 + $0x30] sm:$0xf] }
  0x16   :  { %699 = vmatpush.bf16.msra.mxu1 %v1235_v25  ;;  %v1346_v40 = vld [vmem:[#allocation2 + $0x1c0] sm:$0xf]  ;;  %v1667_v41 = vld [vmem:[#allocation2 + $0x1c4] sm:$0xf0]  ;;  %v1283_v45 = vor.u32 %v1651_v39, %v1282_v37  ;;  %v1617_v48 = vld [vmem:[#allocation2 + $0x34] sm:$0xf0] }
  0x17   :  { %v1218_v42 = vld [vmem:[#allocation2 + $0xc0] sm:$0xf]  ;;  %v1635_v43 = vld [vmem:[#allocation2 + $0xc4] sm:$0xf0]  ;;  %687 = vmatpush.bf16.msra.mxu0 %v1163_v29  ;;  %v1347_v46 = vor.u32 %v1667_v41, %v1346_v40  ;;  %v1274_v49 = vld [vmem:[#allocation2 + $0x130] sm:$0xf]  ;;  %v1147_v56 = vor.u32 %v1617_v48, %v1146_v47 }
  0x18   :  { %713 = vmatpush.bf16.msra.mxu2 %v1291_v33  ;;  %v1219_v50 = vor.u32 %v1635_v43, %v1218_v42  ;;  %v1649_v51 = vld [vmem:[#allocation2 + $0x134] sm:$0xf0]  ;;  %v1338_v52 = vld [vmem:[#allocation2 + $0x1b0] sm:$0xf]  ;;  %v1138_v59 = vld [vmem:[#allocation2 + $0x20] sm:$0xf] }
  0x19   :  { %726 = vmatpush.bf16.msra.mxu3 %v1355_v34  ;;  %v1665_v53 = vld [vmem:[#allocation2 + $0x1b4] sm:$0xf0]  ;;  %v1210_v54 = vld [vmem:[#allocation2 + $0xb0] sm:$0xf]  ;;  %v1275_v57 = vor.u32 %v1649_v51, %v1274_v49  ;;  %v1615_v60 = vld [vmem:[#allocation2 + $0x24] sm:$0xf0] }
  0x1a   :  { %700 = vmatpush.bf16.msra.mxu1 %v1227_v38  ;;  %v1633_v55 = vld [vmem:[#allocation2 + $0xb4] sm:$0xf0]  ;;  %v1339_v58 = vor.u32 %v1665_v53, %v1338_v52  ;;  %v1266_v61 = vld [vmem:[#allocation2 + $0x120] sm:$0xf]  ;;  %v1647_v63 = vld [vmem:[#allocation2 + $0x124] sm:$0xf0]  ;;  %v1139_v4 = vor.u32 %v1615_v60, %v1138_v59 }
  0x1b   :  { %688 = vmatpush.bf16.msra.mxu0 %v1155_v44  ;;  %v1211_v62 = vor.u32 %v1633_v55, %v1210_v54  ;;  %v1330_v0 = vld [vmem:[#allocation2 + $0x1a0] sm:$0xf]  ;;  %v1663_v1 = vld [vmem:[#allocation2 + $0x1a4] sm:$0xf0]  ;;  %v1267_v5 = vor.u32 %v1647_v63, %v1266_v61  ;;  %v1130_v7 = vld [vmem:[#allocation2 + $0x10] sm:$0xf] }
  0x1c   :  { %714 = vmatpush.bf16.msra.mxu2 %v1283_v45  ;;  %v1202_v2 = vld [vmem:[#allocation2 + $0xa0] sm:$0xf]  ;;  %v1631_v3 = vld [vmem:[#allocation2 + $0xa4] sm:$0xf0]  ;;  %v1331_v6 = vor.u32 %v1663_v1, %v1330_v0  ;;  %v1613_v8 = vld [vmem:[#allocation2 + $0x14] sm:$0xf0] }
  0x1d   :  { %727 = vmatpush.bf16.msra.mxu3 %v1347_v46  ;;  %v1258_v9 = vld [vmem:[#allocation2 + $0x110] sm:$0xf]  ;;  %v1203_v10 = vor.u32 %v1631_v3, %v1202_v2  ;;  %v1645_v11 = vld [vmem:[#allocation2 + $0x114] sm:$0xf0]  ;;  %v1122_v16 = vld [vmem:[#allocation2] sm:$0xf]  ;;  %v1131_v17 = vor.u32 %v1613_v8, %v1130_v7 }
  0x1e   :  { %701 = vmatpush.bf16.msra.mxu1 %v1219_v50  ;;  %v1322_v12 = vld [vmem:[#allocation2 + $0x190] sm:$0xf]  ;;  %v1661_v13 = vld [vmem:[#allocation2 + $0x194] sm:$0xf0]  ;;  %v1611_v18 = vld [vmem:[#allocation2 + $0x4] sm:$0xf0]  ;;  %v1259_v21 = vor.u32 %v1645_v11, %v1258_v9 }
  0x1f   :  { %689 = vmatpush.bf16.msra.mxu0 %v1147_v56  ;;  %v1194_v14 = vld [vmem:[#allocation2 + $0x90] sm:$0xf]  ;;  %v1629_v15 = vld [vmem:[#allocation2 + $0x94] sm:$0xf0]  ;;  %v1250_v19 = vld [vmem:[#allocation2 + $0x100] sm:$0xf]  ;;  %v1323_v22 = vor.u32 %v1661_v13, %v1322_v12  ;;  %v1123_v33 = vor.u32 %v1611_v18, %v1122_v16 }
  0x20   :  { %715 = vmatpush.bf16.msra.mxu2 %v1275_v57  ;;  %v1643_v20 = vld [vmem:[#allocation2 + $0x104] sm:$0xf0]  ;;  %v1314_v23 = vld [vmem:[#allocation2 + $0x180] sm:$0xf]  ;;  %v1195_v26 = vor.u32 %v1629_v15, %v1194_v14  ;;  %v1434_v27 = vld [vmem:[#allocation2 + $0x270] sm:$0xf] }
  0x21   :  { %728 = vmatpush.bf16.msra.mxu3 %v1339_v58  ;;  %v1659_v24 = vld [vmem:[#allocation2 + $0x184] sm:$0xf0]  ;;  %v1689_v28 = vld [vmem:[#allocation2 + $0x274] sm:$0xf0]  ;;  %v1624_v29 = vld [vmem:[#allocation2 + $0x74] sm:$0xf]  ;;  %v1251_v38 = vor.u32 %v1643_v20, %v1250_v19 }
  0x22   :  { %702 = vmatpush.bf16.msra.mxu1 %v1211_v62  ;;  %v60_v25 = vld [vmem:[%s1922_s0 + $0x8] sm:$0xff]  ;;  %v1180_v30 = vld [vmem:[#allocation2 + $0x78] sm:$0xf0]  ;;  %v1186_v31 = vld [vmem:[#allocation2 + $0x80] sm:$0xf]  ;;  %v1315_v39 = vor.u32 %v1659_v24, %v1314_v23  ;;  %v1435_v43 = vor.u32 %v1689_v28, %v1434_v27  ;;  %vm681_vm0 = vcmask 130048  }
  0x23   :  { %690 = vmatpush.bf16.msra.mxu0 %v1139_v4  ;;  %v59_v32 = vld [vmem:[%s1922_s0] sm:$0xff]  ;;  %v1627_v34 = vld [vmem:[#allocation2 + $0x84] sm:$0xf0]  ;;  %v173_v35 = vunpack.c.l.b16 %v60_v25  ;;  %v1498_v40 = vld [vmem:[#allocation2 + $0x2f0] sm:$0xf]  ;;  %v1183_v44 = vor.u32 %v1624_v29, %v1180_v30  ;;  %v174_v53 = vunpack.c.h.b16 %v60_v25 }
  0x24   :  { %716 = vmatpush.bf16.msra.mxu2 %v1267_v5  ;;  %v1506_v36 = vld [vmem:[#allocation2 + $0x300] sm:$0xf]  ;;  %v1707_v37 = vld [vmem:[#allocation2 + $0x304] sm:$0xf0]  ;;  %v1705_v41 = vld [vmem:[#allocation2 + $0x2f4] sm:$0xf0]  ;;  %v171_v42 = vunpack.c.l.b16 %v59_v32  ;;  %v1187_v48 = vor.u32 %v1627_v34, %v1186_v31  ;;  %v172_v54 = vunpack.c.h.b16 %v59_v32 }
  0x25   :  { %729 = vmatpush.bf16.msra.mxu3 %v1331_v6  ;;  %v1640_v45 = vld [vmem:[#allocation2 + $0xf4] sm:$0xf]  ;;  %v1244_v46 = vld [vmem:[#allocation2 + $0xf8] sm:$0xf0]  ;;  %v1426_v47 = vld [vmem:[#allocation2 + $0x260] sm:$0xf]  ;;  %v1507_v49 = vor.u32 %v1707_v37, %v1506_v36  ;;  %v1850_v55 = vpack.c.b16 %v173_v35, %v173_v35  ;;  %v1499_v56 = vor.u32 %v1705_v41, %v1498_v40  ;;  %v1854_v2 = vpack.c.b16 %v174_v53, %v174_v53 }
  0x26   :  { %703 = vmatpush.bf16.msra.mxu1 %v1203_v10  ;;  %v1687_v50 = vld [vmem:[#allocation2 + $0x264] sm:$0xf0]  ;;  %v1622_v51 = vld [vmem:[#allocation2 + $0x64] sm:$0xf]  ;;  %v1172_v52 = vld [vmem:[#allocation2 + $0x68] sm:$0xf0]  ;;  %v1247_v57 = vor.u32 %v1640_v45, %v1244_v46  ;;  %v1852_v58 = vpack.c.b16 %v171_v42, %v171_v42  ;;  %v1856_v3 = vpack.c.b16 %v172_v54, %v172_v54 }
  0x27   :  { %691 = vmatpush.bf16.msra.mxu0 %v1131_v17  ;;  %v1490_v59 = vld [vmem:[#allocation2 + $0x2e0] sm:$0xf]  ;;  %v1703_v60 = vld [vmem:[#allocation2 + $0x2e4] sm:$0xf0]  ;;  %v1427_v61 = vor.u32 %v1687_v50, %v1426_v47  ;;  %v1175_v62 = vor.u32 %v1622_v51, %v1172_v52  ;;  %v1638_v63 = vld [vmem:[#allocation2 + $0xe4] sm:$0xf] }
  0x28   :  { %717 = vmatpush.bf16.msra.mxu2 %v1259_v21  ;;  %v1236_v0 = vld [vmem:[#allocation2 + $0xe8] sm:$0xf0]  ;;  %v1418_v1 = vld [vmem:[#allocation2 + $0x250] sm:$0xf]  ;;  %v1685_v4 = vld [vmem:[#allocation2 + $0x254] sm:$0xf0]  ;;  %v1491_v7 = vor.u32 %v1703_v60, %v1490_v59 }
  0x29   :  { %730 = vmatpush.bf16.msra.mxu3 %v1323_v22  ;;  %v1620_v5 = vld [vmem:[#allocation2 + $0x54] sm:$0xf]  ;;  %v1164_v6 = vld [vmem:[#allocation2 + $0x58] sm:$0xf0]  ;;  %v1239_v8 = vor.u32 %v1638_v63, %v1236_v0  ;;  %v1482_v9 = vld [vmem:[#allocation2 + $0x2d0] sm:$0xf]  ;;  %v1419_v11 = vor.u32 %v1685_v4, %v1418_v1 }
  0x2a   :  { %704 = vmatpush.bf16.msra.mxu1 %v1195_v26  ;;  %v1701_v10 = vld [vmem:[#allocation2 + $0x2d4] sm:$0xf0]  ;;  %v1167_v12 = vor.u32 %v1620_v5, %v1164_v6  ;;  %v1636_v13 = vld [vmem:[#allocation2 + $0xd4] sm:$0xf]  ;;  %v1228_v14 = vld [vmem:[#allocation2 + $0xd8] sm:$0xf0] }
  0x2b   :  { %692 = vmatpush.bf16.msra.mxu0 %v1123_v33  ;;  %v1410_v15 = vld [vmem:[#allocation2 + $0x240] sm:$0xf]  ;;  %v1683_v16 = vld [vmem:[#allocation2 + $0x244] sm:$0xf0]  ;;  %v1618_v17 = vld [vmem:[#allocation2 + $0x44] sm:$0xf]  ;;  %v1483_v19 = vor.u32 %v1701_v10, %v1482_v9  ;;  %v1231_v20 = vor.u32 %v1636_v13, %v1228_v14 }
  0x2c   :  { %718 = vmatpush.bf16.msra.mxu2 %v1251_v38  ;;  %v1156_v18 = vld [vmem:[#allocation2 + $0x48] sm:$0xf0]  ;;  %v1474_v21 = vld [vmem:[#allocation2 + $0x2c0] sm:$0xf]  ;;  %v1699_v22 = vld [vmem:[#allocation2 + $0x2c4] sm:$0xf0]  ;;  %v1411_v24 = vor.u32 %v1683_v16, %v1410_v15 }
  0x2d   :  { %731 = vmatpush.bf16.msra.mxu3 %v1315_v39  ;;  %v62_v23 = vld [vmem:[%s1922_s0 + $0x18] sm:$0xf]  ;;  %v1159_v25 = vor.u32 %v1618_v17, %v1156_v18  ;;  %v1634_v26 = vld [vmem:[#allocation2 + $0xc4] sm:$0xf]  ;;  %v1220_v27 = vld [vmem:[#allocation2 + $0xc8] sm:$0xf0]  ;;  %v1475_v32 = vor.u32 %v1699_v22, %v1474_v21 }
  0x2e   :  { %705 = vmatpush.bf16.msra.mxu1 %v1187_v48  ;;  %693 = vmatmul.bf16.vlgmr.msra.gmra.mxu0 %v1852_v58  ;;  %v1402_v28 = vld [vmem:[#allocation2 + $0x230] sm:$0xf]  ;;  %v1681_v29 = vld [vmem:[#allocation2 + $0x234] sm:$0xf0]  ;;  %v1616_v30 = vld [vmem:[#allocation2 + $0x34] sm:$0xf]  ;;  %v177_v33 = vunpack.c.l.b16 %v62_v23  ;;  %v1223_v34 = vor.u32 %v1634_v26, %v1220_v27 }
  0x2f   :  { %737 = vmatpush.bf16.msrb.mxu0 %v1435_v43  ;;  %719 = vmatmul.bf16.vlgmr.msra.gmra.mxu2 %v1850_v55  ;;  %v1148_v31 = vld [vmem:[#allocation2 + $0x38] sm:$0xf0]  ;;  %v1466_v35 = vld [vmem:[#allocation2 + $0x2b0] sm:$0xf]  ;;  %v1697_v36 = vld [vmem:[#allocation2 + $0x2b4] sm:$0xf0]  ;;  %v1403_v37 = vor.u32 %v1681_v29, %v1402_v28 }
  0x30   :  { %770 = vmatpush.bf16.msrb.mxu2 %v1507_v49  ;;  %732 = vmatmul.bf16.vlgmr.msra.gmra.mxu3 %v1854_v2  ;;  %v1151_v38 = vor.u32 %v1616_v30, %v1148_v31  ;;  %v1632_v39 = vld [vmem:[#allocation2 + $0xb4] sm:$0xf]  ;;  %v1212_v40 = vld [vmem:[#allocation2 + $0xb8] sm:$0xf0]  ;;  %v1394_v41 = vld [vmem:[#allocation2 + $0x220] sm:$0xf]  ;;  %v1467_v45 = vor.u32 %v1697_v36, %v1466_v35  ;;  %v1865_v46 = vpack.c.b16 %v177_v33, %v177_v33 }
  0x31   :  { %776 = vmatpush.bf16.msrb.mxu3 %v1183_v44  ;;  %706 = vmatmul.bf16.vlgmr.msra.gmra.mxu1 %v1856_v3  ;;  %v1679_v42 = vld [vmem:[#allocation2 + $0x224] sm:$0xf0]  ;;  %v1614_v43 = vld [vmem:[#allocation2 + $0x24] sm:$0xf]  ;;  %v1140_v44 = vld [vmem:[#allocation2 + $0x28] sm:$0xf0]  ;;  %v1215_v47 = vor.u32 %v1632_v39, %v1212_v40 }
  0x32   :  { %750 = vmatpush.bf16.msrb.mxu1 %v1499_v56  ;;  %v1458_v48 = vld [vmem:[#allocation2 + $0x2a0] sm:$0xf]  ;;  %v1695_v49 = vld [vmem:[#allocation2 + $0x2a4] sm:$0xf0]  ;;  %v1395_v50 = vor.u32 %v1679_v42, %v1394_v41  ;;  %v1143_v51 = vor.u32 %v1614_v43, %v1140_v44  ;;  %v1630_v52 = vld [vmem:[#allocation2 + $0xa4] sm:$0xf] }
  0x33   :  { %738 = vmatpush.bf16.msrb.mxu0 %v1427_v61  ;;  %v1204_v53 = vld [vmem:[#allocation2 + $0xa8] sm:$0xf0]  ;;  %v1386_v54 = vld [vmem:[#allocation2 + $0x210] sm:$0xf]  ;;  %v1677_v56 = vld [vmem:[#allocation2 + $0x214] sm:$0xf0]  ;;  %v1459_v60 = vor.u32 %v1695_v49, %v1458_v48 }
  0x34   :  { %789 = vmatpush.bf16.msra.mxu2 %v1247_v57  ;;  %v1612_v57 = vld [vmem:[#allocation2 + $0x14] sm:$0xf]  ;;  %v1132_v59 = vld [vmem:[#allocation2 + $0x18] sm:$0xf0]  ;;  %v1450_v61 = vld [vmem:[#allocation2 + $0x290] sm:$0xf]  ;;  %v1387_v4 = vor.u32 %v1677_v56, %v1386_v54 }
  0x35   :  { %777 = vmatpush.bf16.msrb.mxu3 %v1175_v62  ;;  %v1207_v62 = vor.u32 %v1630_v52, %v1204_v53  ;;  %v1693_v63 = vld [vmem:[#allocation2 + $0x294] sm:$0xf0]  ;;  %v1628_v0 = vld [vmem:[#allocation2 + $0x94] sm:$0xf]  ;;  %v1196_v1 = vld [vmem:[#allocation2 + $0x98] sm:$0xf0]  ;;  %v1135_v5 = vor.u32 %v1612_v57, %v1132_v59 }
  0x36   :  { %751 = vmatpush.bf16.msrb.mxu1 %v1491_v7  ;;  %v1378_v6 = vld [vmem:[#allocation2 + $0x200] sm:$0xf]  ;;  %v1675_v7 = vld [vmem:[#allocation2 + $0x204] sm:$0xf0]  ;;  %v1610_v9 = vld [vmem:[#allocation2 + $0x4] sm:$0xf]  ;;  %v1199_v16 = vor.u32 %v1628_v0, %v1196_v1 }
  0x37   :  { %739 = vmatpush.bf16.msrb.mxu0 %v1419_v11  ;;  %v1124_v10 = vld [vmem:[#allocation2 + $0x8] sm:$0xf0]  ;;  %v1656_v11 = vld [vmem:[#allocation2 + $0x174] sm:$0xf]  ;;  %v1308_v13 = vld [vmem:[#allocation2 + $0x178] sm:$0xf0] }
  0x38   :  { %790 = vmatpush.bf16.msra.mxu2 %v1239_v8  ;;  %v61_v8 = vld [vmem:[%s1922_s0 + $0x10] sm:$0xff]  ;;  %v1436_v15 = vld [vmem:[#allocation2 + $0x278] sm:$0xf0]  ;;  %v1442_v17 = vld [vmem:[#allocation2 + $0x280] sm:$0xf]  ;;  %v1127_v21 = vor.u32 %v1610_v9, %v1124_v10 }
  0x39   :  { %778 = vmatpush.bf16.msrb.mxu3 %v1167_v12  ;;  %v1451_v12 = vor.u32 %v1693_v63, %v1450_v61  ;;  %v1688_v14 = vld [vmem:[#allocation2 + $0x274] sm:$0xf]  ;;  %v1691_v18 = vld [vmem:[#allocation2 + $0x284] sm:$0xf0]  ;;  %v1626_v22 = vld [vmem:[#allocation2 + $0x84] sm:$0xf]  ;;  %v176_v30 = vunpack.c.h.b16 %v61_v8 }
  0x3a   :  { %752 = vmatpush.bf16.msrb.mxu1 %v1483_v19  ;;  %v175_v19 = vunpack.c.l.b16 %v61_v8  ;;  %v1188_v23 = vld [vmem:[#allocation2 + $0x88] sm:$0xf0]  ;;  %v1439_v26 = vor.u32 %v1688_v14, %v1436_v15  ;;  %v1372_v27 = vld [vmem:[#allocation2 + $0x1f8] sm:$0xf0]  ;;  %v1704_v28 = vld [vmem:[#allocation2 + $0x2f4] sm:$0xf]  ;;  %v1443_v31 = vor.u32 %v1691_v18, %v1442_v17 }
  0x3b   :  { %740 = vmatpush.bf16.msrb.mxu0 %v1411_v24  ;;  %v1672_v24 = vld [vmem:[#allocation2 + $0x1f4] sm:$0xf]  ;;  %v1500_v29 = vld [vmem:[#allocation2 + $0x2f8] sm:$0xf0]  ;;  %v1300_v33 = vld [vmem:[#allocation2 + $0x168] sm:$0xf0]  ;;  %v1191_v35 = vor.u32 %v1626_v22, %v1188_v23  ;;  %v1874_v41 = vpack.c.b16 %v176_v30, %v176_v30 }
  0x3c   :  { %791 = vmatpush.bf16.msra.mxu2 %v1231_v20  ;;  %v1379_v20 = vor.u32 %v1675_v7, %v1378_v6  ;;  %v1686_v36 = vld [vmem:[#allocation2 + $0x264] sm:$0xf]  ;;  %v1503_v39 = vor.u32 %v1704_v28, %v1500_v29  ;;  %v1364_v43 = vld [vmem:[#allocation2 + $0x1e8] sm:$0xf0]  ;;  %v1652_v48 = vld [vmem:[#allocation2 + $0x154] sm:$0xf] }
  0x3d   :  { %779 = vmatpush.bf16.msrb.mxu3 %v1159_v25  ;;  %v1311_v25 = vor.u32 %v1656_v11, %v1308_v13  ;;  %v1670_v40 = vld [vmem:[#allocation2 + $0x1e4] sm:$0xf]  ;;  %v1292_v49 = vld [vmem:[#allocation2 + $0x158] sm:$0xf0]  ;;  %v1668_v54 = vld [vmem:[#allocation2 + $0x1d4] sm:$0xf] }
  0x3e   :  { %753 = vmatpush.bf16.msrb.mxu1 %v1475_v32  ;;  %v1654_v32 = vld [vmem:[#allocation2 + $0x164] sm:$0xf]  ;;  %v1367_v52 = vor.u32 %v1670_v40, %v1364_v43  ;;  %v1356_v56 = vld [vmem:[#allocation2 + $0x1d8] sm:$0xf0]  ;;  %v1295_v57 = vor.u32 %v1652_v48, %v1292_v49  ;;  %v1700_v59 = vld [vmem:[#allocation2 + $0x2d4] sm:$0xf] }
  0x3f   :  { %741 = vmatpush.bf16.msrb.mxu0 %v1403_v37  ;;  %1512 = vmatmul.msk.bf16.vlgmr.msrb.gmra.mxu2 %vm681_vm0, %v1865_v46  ;;  %v1428_v37 = vld [vmem:[#allocation2 + $0x268] sm:$0xf0]  ;;  %v1303_v42 = vor.u32 %v1654_v32, %v1300_v33  ;;  %v1702_v44 = vld [vmem:[#allocation2 + $0x2e4] sm:$0xf]  ;;  %v1680_v13 = vld [vmem:[#allocation2 + $0x234] sm:$0xf] }
  0x40   :  { %792 = vmatpush.bf16.msra.mxu2 %v1223_v34  ;;  %v1872_v34 = vpack.c.b16 %v175_v19, %v175_v19  ;;  %v1284_v63 = vld [vmem:[#allocation2 + $0x148] sm:$0xf0]  ;;  %v1682_v0 = vld [vmem:[#allocation2 + $0x244] sm:$0xf]  ;;  %v1404_v14 = vld [vmem:[#allocation2 + $0x238] sm:$0xf0] }
  0x41   :  { %780 = vmatpush.bf16.msrb.mxu3 %v1151_v38  ;;  %v1375_v38 = vor.u32 %v1672_v24, %v1372_v27  ;;  %v1412_v1 = vld [vmem:[#allocation2 + $0x248] sm:$0xf0]  ;;  %v1666_v6 = vld [vmem:[#allocation2 + $0x1c4] sm:$0xf]  ;;  %v1340_v18 = vld [vmem:[#allocation2 + $0x1b8] sm:$0xf0] }
  0x42   :  { %754 = vmatpush.bf16.msrb.mxu1 %v1467_v45  ;;  %v1492_v45 = vld [vmem:[#allocation2 + $0x2e8] sm:$0xf0]  ;;  %v1698_v9 = vld [vmem:[#allocation2 + $0x2c4] sm:$0xf]  ;;  %v1415_v11 = vor.u32 %v1682_v0, %v1412_v1  ;;  %v1696_v19 = vld [vmem:[#allocation2 + $0x2b4] sm:$0xf] }
  0x43   :  { %742 = vmatpush.bf16.msrb.mxu0 %v1395_v50  ;;  %v1684_v50 = vld [vmem:[#allocation2 + $0x254] sm:$0xf]  ;;  %v1495_v53 = vor.u32 %v1702_v44, %v1492_v45  ;;  %v1348_v8 = vld [vmem:[#allocation2 + $0x1c8] sm:$0xf0]  ;;  %v1646_v22 = vld [vmem:[#allocation2 + $0x124] sm:$0xf] }
  0x44   :  { %793 = vmatpush.bf16.msra.mxu2 %v1215_v47  ;;  %v1431_v47 = vor.u32 %v1686_v36, %v1428_v37  ;;  %v1476_v10 = vld [vmem:[#allocation2 + $0x2c8] sm:$0xf0]  ;;  %v1351_v15 = vor.u32 %v1666_v6, %v1348_v8  ;;  %v1678_v24 = vld [vmem:[#allocation2 + $0x224] sm:$0xf]  ;;  %v1260_v36 = vld [vmem:[#allocation2 + $0x118] sm:$0xf0] }
  0x45   :  { %781 = vmatpush.bf16.msrb.mxu3 %v1143_v51  ;;  %v1420_v51 = vld [vmem:[#allocation2 + $0x258] sm:$0xf0]  ;;  %v1268_v23 = vld [vmem:[#allocation2 + $0x128] sm:$0xf0]  ;;  %v1662_v28 = vld [vmem:[#allocation2 + $0x1a4] sm:$0xf] }
  0x46   :  { %755 = vmatpush.bf16.msrb.mxu1 %v1459_v60  ;;  %v1484_v60 = vld [vmem:[#allocation2 + $0x2d8] sm:$0xf0]  ;;  %v1423_v61 = vor.u32 %v1684_v50, %v1420_v51  ;;  %v1271_v29 = vor.u32 %v1646_v22, %v1268_v23  ;;  %v1332_v30 = vld [vmem:[#allocation2 + $0x1a8] sm:$0xf0]  ;;  %v1676_v37 = vld [vmem:[#allocation2 + $0x214] sm:$0xf] }
  0x47   :  { %743 = vmatpush.bf16.msrb.mxu0 %v1387_v4  ;;  %v1359_v4 = vor.u32 %v1668_v54, %v1356_v56  ;;  %v1460_v32 = vld [vmem:[#allocation2 + $0x2a8] sm:$0xf0]  ;;  %v1324_v44 = vld [vmem:[#allocation2 + $0x198] sm:$0xf0]  ;;  %v1692_v45 = vld [vmem:[#allocation2 + $0x294] sm:$0xf] }
  0x48   :  { %794 = vmatpush.bf16.msra.mxu2 %v1207_v62  ;;  %v1650_v62 = vld [vmem:[#allocation2 + $0x144] sm:$0xf]  ;;  %v1252_v50 = vld [vmem:[#allocation2 + $0x108] sm:$0xf0]  ;;  %v1713_v8 = vld [vmem:[#allocation4 + $0x28] sm:$0xff] }
  0x49   :  { %782 = vmatpush.bf16.msrb.mxu3 %v1135_v5  ;;  %v1487_v5 = vor.u32 %v1700_v59, %v1484_v60  ;;  %v1287_v7 = vor.u32 %v1650_v62, %v1284_v63  ;;  %v1642_v49 = vld [vmem:[#allocation2 + $0x104] sm:$0xf]  ;;  %v1316_v59 = vld [vmem:[#allocation2 + $0x188] sm:$0xf0] }
  0x4a   :  { %756 = vmatpush.bf16.msrb.mxu1 %v1451_v12  ;;  %v1648_v12 = vld [vmem:[#allocation2 + $0x134] sm:$0xf]  ;;  %v1674_v51 = vld [vmem:[#allocation2 + $0x204] sm:$0xf]  ;;  %v1255_v56 = vor.u32 %v1642_v49, %v1252_v50  ;;  %v1444_v62 = vld [vmem:[#allocation2 + $0x288] sm:$0xf0] }
  0x4b   :  { %744 = vmatpush.bf16.msrb.mxu0 %v1379_v20  ;;  %v1468_v20 = vld [vmem:[#allocation2 + $0x2b8] sm:$0xf0]  ;;  %v1706_v63 = vld [vmem:[#allocation2 + $0x304] sm:$0xf]  ;;  %v1508_v0 = vld [vmem:[#allocation2 + $0x308] sm:$0xf0] }
  0x4c   :  { %795 = vmatpush.bf16.msra.mxu2 %v1199_v16  ;;  %v1664_v16 = vld [vmem:[#allocation2 + $0x1b4] sm:$0xf]  ;;  %v1471_v27 = vor.u32 %v1696_v19, %v1468_v20  ;;  %v1715_v6 = vld [vmem:[#allocation4 + $0x38] sm:$0xff] }
  0x4d   :  { %783 = vmatpush.bf16.msrb.mxu3 %v1127_v21  ;;  %v1407_v21 = vor.u32 %v1680_v13, %v1404_v14 }
  0x4e   :  { %757 = vmatpush.bf16.msrb.mxu1 %v1443_v31  ;;  %745 = vmatmul.bf16.vlgmr.msrb.gmra.mxu0 %v1872_v34  ;;  %v1694_v31 = vld [vmem:[#allocation2 + $0x2a4] sm:$0xf] }
  0x4f   :  { %802 = vmatpush.bf16.msra.mxu0 %v1311_v25  ;;  %v1396_v25 = vld [vmem:[#allocation2 + $0x228] sm:$0xf0]  ;;  %v1463_v40 = vor.u32 %v1694_v31, %v1460_v32 }
  0x50   :  { %796 = vmatpush.bf16.msra.mxu2 %v1191_v35  ;;  %784 = vmatmul.bf16.vlgmr.msrb.gmra.mxu3 %v1852_v58  ;;  %v1479_v58 = vor.u32 %v1698_v9, %v1476_v10  ;;  %v1399_v33 = vor.u32 %v1678_v24, %v1396_v25  ;;  %v1644_v35 = vld [vmem:[#allocation2 + $0x114] sm:$0xf]  ;;  %v1709_v10 = vld [vmem:[#allocation4 + $0x8] sm:$0xff] }
  0x51   :  { %828 = vmatpush.bf16.msra.mxu3 %v1439_v26  ;;  %758 = vmatmul.bf16.vlgmr.msrb.gmra.mxu1 %v1874_v41  ;;  %v1343_v26 = vor.u32 %v1664_v16, %v1340_v18  ;;  %v1263_v43 = vor.u32 %v1644_v35, %v1260_v36  ;;  %v1712_v9 = vld [vmem:[#allocation4 + $0x20] sm:$0xff] }
  0x52   :  { %815 = vmatpush.bf16.msra.mxu1 %v1375_v38  ;;  %v1388_v38 = vld [vmem:[#allocation2 + $0x218] sm:$0xf0] }
  0x53   :  { %803 = vmatpush.bf16.msra.mxu0 %v1303_v42  ;;  %797 = vmatmul.bf16.vlgmr.msra.gmra.mxu2 %v1856_v3  ;;  %v1276_v3 = vld [vmem:[#allocation2 + $0x138] sm:$0xf0]  ;;  %v1660_v42 = vld [vmem:[#allocation2 + $0x194] sm:$0xf]  ;;  %v1391_v48 = vor.u32 %v1676_v37, %v1388_v38 }
  0x54   :  { %841 = vmatpush.bf16.msrb.mxu2 %v1503_v39  ;;  %v1279_v17 = vor.u32 %v1648_v12, %v1276_v3  ;;  %v1335_v39 = vor.u32 %v1662_v28, %v1332_v30  ;;  %v1721_v30 = vld [vmem:[#allocation4 + $0x68] sm:$0xff] }
  0x55   :  { %829 = vmatpush.bf16.msra.mxu3 %v1431_v47  ;;  %v1452_v47 = vld [vmem:[#allocation2 + $0x298] sm:$0xf0] }
  0x56   :  { %816 = vmatpush.bf16.msra.mxu1 %v1367_v52  ;;  %v1380_v52 = vld [vmem:[#allocation2 + $0x208] sm:$0xf0]  ;;  %v1455_v54 = vor.u32 %v1692_v45, %v1452_v47  ;;  %v1716_v45 = vld [vmem:[#allocation4 + $0x40] sm:$0xff] }
  0x57   :  { %804 = vmatpush.bf16.msra.mxu0 %v1295_v57  ;;  %v1658_v57 = vld [vmem:[#allocation2 + $0x184] sm:$0xf]  ;;  %v1383_v60 = vor.u32 %v1674_v51, %v1380_v52 }
  0x58   :  { %842 = vmatpush.bf16.msrb.mxu2 %v1495_v53  ;;  %v1327_v53 = vor.u32 %v1660_v42, %v1324_v44  ;;  %v1319_v1 = vor.u32 %v1658_v57, %v1316_v59  ;;  %v1717_v44 = vld [vmem:[#allocation4 + $0x48] sm:$0xff] }
  0x59   :  { %830 = vmatpush.bf16.msra.mxu3 %v1423_v61  ;;  %v1690_v61 = vld [vmem:[#allocation2 + $0x284] sm:$0xf] }
  0x5a   :  { %817 = vmatpush.bf16.msra.mxu1 %v1359_v4  ;;  %v1447_v4 = vor.u32 %v1690_v61, %v1444_v62 }
  0x5b   :  { %805 = vmatpush.bf16.msra.mxu0 %v1287_v7  ;;  %v1714_v7 = vld [vmem:[#allocation4 + $0x30] sm:$0xff] }
  0x5c   :  { %843 = vmatpush.bf16.msrb.mxu2 %v1487_v5  ;;  %v1511_v5 = vor.u32 %v1706_v63, %v1508_v0 }
  0x5d   :  { %831 = vmatpush.bf16.msra.mxu3 %v1415_v11 }
  0x5e   :  { %818 = vmatpush.bf16.msra.mxu1 %v1351_v15 }
  0x5f   :  { %806 = vmatpush.bf16.msra.mxu0 %v1279_v17 }
  0x60   :  { %844 = vmatpush.bf16.msrb.mxu2 %v1479_v58 }
  0x61   :  { %832 = vmatpush.bf16.msra.mxu3 %v1407_v21  ;;  %v1723_v21 = vld [vmem:[#allocation4 + $0x78] sm:$0xff] }
  0x62   :  { %819 = vmatpush.bf16.msra.mxu1 %v1343_v26  ;;  %v1722_v26 = vld [vmem:[#allocation4 + $0x70] sm:$0xff] }
  0x63   :  { %807 = vmatpush.bf16.msra.mxu0 %v1271_v29 }
  0x64   :  { %845 = vmatpush.bf16.msrb.mxu2 %v1471_v27 }
  0x65   :  { %833 = vmatpush.bf16.msra.mxu3 %v1399_v33  ;;  %v1720_v33 = vld [vmem:[#allocation4 + $0x60] sm:$0xff] }
  0x66   :  { %820 = vmatpush.bf16.msra.mxu1 %v1335_v39  ;;  %v1719_v39 = vld [vmem:[#allocation4 + $0x58] sm:$0xff] }
  0x67   :  { %808 = vmatpush.bf16.msra.mxu0 %v1263_v43 }
  0x68   :  { %846 = vmatpush.bf16.msrb.mxu2 %v1463_v40  ;;  %v1718_v40 = vld [vmem:[#allocation4 + $0x50] sm:$0xff] }
  0x69   :  { %834 = vmatpush.bf16.msra.mxu3 %v1391_v48 }
  0x6a   :  { %821 = vmatpush.bf16.msra.mxu1 %v1327_v53 }
  0x6b   :  { %809 = vmatpush.bf16.msra.mxu0 %v1255_v56 }
  0x6c   :  { %847 = vmatpush.bf16.msrb.mxu2 %v1455_v54 }
  0x6d   :  { %835 = vmatpush.bf16.msra.mxu3 %v1383_v60 }
  0x6e   :  { %822 = vmatpush.bf16.msra.mxu1 %v1319_v1  ;;  %810 = vmatmul.bf16.vlgmr.msra.gmra.mxu0 %v1850_v55  ;;  %v1711_v55 = vld [vmem:[#allocation4 + $0x18] sm:$0xff] }
  0x70   :  { %836 = vmatmul.bf16.vlgmr.msra.gmra.mxu3 %v1872_v34  ;;  %848 = vmatpush.bf16.msrb.mxu2 %v1447_v4  ;;  %v1710_v34 = vld [vmem:[#allocation4 + $0x10] sm:$0xff] }
  0x71   :  { %823 = vmatmul.bf16.vlgmr.msra.gmra.mxu1 %v1854_v2  ;;  %1016 = vmatpush.bf16.msrb.mxu3 %v1723_v21 }
  0x72   :  { %1003 = vmatpush.bf16.msrb.mxu1 %v1715_v6 }
  0x73   :  { %849 = vmatmul.bf16.vlgmr.msrb.gmra.mxu2 %v1874_v41  ;;  %v1708_v41 = vld [vmem:[#allocation4] sm:$0xff] }
  0x74   :  { %861 = vmatpush.bf16.msra.mxu2 %v1511_v5 }
  0x75   :  { %1017 = vmatpush.bf16.msrb.mxu3 %v1722_v26 }
  0x76   :  { %1004 = vmatpush.bf16.msrb.mxu1 %v1714_v7  ;;  %v1731_v7 = vld [vmem:[%s1927_s5 + $0x38] sm:$0xff] }
  0x77   :  { %1099 = vmatpush.bf16.msrb.mxu0 %v1731_v7 }
  0x79   :  { %1018 = vmatpush.bf16.msrb.mxu3 %v1721_v30 }
  0x7a   :  { %1005 = vmatpush.bf16.msrb.mxu1 %v1713_v8  ;;  %v1730_v8 = vld [vmem:[%s1927_s5 + $0x30] sm:$0xff] }
  0x7b   :  { %1100 = vmatpush.bf16.msrb.mxu0 %v1730_v8 }
  0x7d   :  { %1019 = vmatpush.bf16.msrb.mxu3 %v1720_v33 }
  0x7e   :  { %1006 = vmatpush.bf16.msrb.mxu1 %v1712_v9  ;;  %v1729_v9 = vld [vmem:[%s1927_s5 + $0x28] sm:$0xff] }
  0x7f   :  { %1101 = vmatpush.bf16.msrb.mxu0 %v1729_v9 }
  0x81   :  { %1020 = vmatpush.bf16.msrb.mxu3 %v1719_v39 }
  0x82   :  { %1007 = vmatpush.bf16.msrb.mxu1 %v1711_v55  ;;  %v1728_v55 = vld [vmem:[%s1927_s5 + $0x20] sm:$0xff] }
  0x83   :  { %1513 = vmatmul.msk.bf16.vlgmr.msra.gmra.mxu2 %vm681_vm0, %v1865_v46  ;;  %v161_v46 = vld [vmem:[%s1924_s2] sm:$0x3]  ;;  %1102 = vmatpush.bf16.msrb.mxu0 %v1728_v55 }
  0x84   :  { %v163_v15 = vperm.slane %v161_v46, 0  ;;  %v164_v49 = vperm.slane %v161_v46, 1  ;;  %v1738_v46 = vld [vmem:[%s1926_s4] ss:$0 sm:$0xff] }
  0x85   :  { %1021 = vmatpush.bf16.msrb.mxu3 %v1718_v40 }
  0x86   :  { %1008 = vmatpush.bf16.msrb.mxu1 %v1710_v34  ;;  %v1727_v34 = vld [vmem:[%s1927_s5 + $0x18] sm:$0xff] }
  0x87   :  { %1103 = vmatpush.bf16.msrb.mxu0 %v1727_v34 }
  0x89   :  { %1022 = vmatpush.bf16.msrb.mxu3 %v1717_v44 }
  0x8a   :  { %1009 = vmatpush.bf16.msrb.mxu1 %v1709_v10  ;;  %v1726_v10 = vld [vmem:[%s1927_s5 + $0x10] sm:$0xff] }
  0x8b   :  { %1104 = vmatpush.bf16.msrb.mxu0 %v1726_v10 }
  0x8d   :  { %1023 = vmatpush.bf16.msrb.mxu3 %v1716_v45 }
  0x8e   :  { %1010 = vmatpush.bf16.msrb.mxu1 %v1708_v41  ;;  %v1725_v41 = vld [vmem:[%s1927_s5 + $0x8] sm:$0xff] }
  0x8f   :  { %1105 = vmatpush.bf16.msrb.mxu0 %v1725_v41 }
  0xab   :  { %v694_v11 = vpop.f32.mrf.mxu0 }
  0xac   :  { %v695_v16 = vadd.f32 %v694_v11, %v163_v15 }
  0xae   :  { %v707_v2 = vpop.f32.mrf.mxu1 }
  0xaf   :  { %v708_v18 = vadd.f32 %v707_v2, %v695_v16 }
  0xb2   :  { %v720_v12 = vpop.f32.mrf.mxu2 }
  0xb3   :  { %v733_v3 = vpop.f32.mrf.mxu3  ;;  %v696_v13 = vpop.f32.mrf.mxu0  ;;  %v721_v20 = vadd.f32 %v720_v12, %v708_v18  ;;  %v1724_v12 = vld [vmem:[%s1927_s5] sm:$0xff] }
  0xb4   :  { %1106 = vmatpush.bf16.msrb.mxu0 %v1724_v12 }
  0xb5   :  { %v734_v22 = vadd.f32 %v733_v3, %v721_v20 }
  0xb6   :  { %v709_v14 = vpop.f32.mrf.mxu1 }
  0xba   :  { %v722_v58 = vpop.f32.mrf.mxu2 }
  0xbb   :  { %v735_v17 = vpop.f32.mrf.mxu3 }
  0xbc   :  { %v1739_v17 = vld [vmem:[%s1928_s6] ss:$0 sm:$0xff] }
  0xc2   :  { %v772_v19 = vpop.f32.mrf.mxu2 }
  0xca   :  { %v774_v25 = vpop.f32.mrf.mxu2 }
  0xcb   :  { %v746_v23 = vpop.f32.mrf.mxu0 }
  0xcc   :  { %v747_v24 = vadd.f32 %v746_v23, %v734_v22 }
  0xce   :  { %v759_v27 = vpop.f32.mrf.mxu1 }
  0xcf   :  { %v760_v28 = vadd.f32 %v759_v27, %v747_v24 }
  0xd1   :  { %v773_v29 = vadd.f32 %v772_v19, %v760_v28 }
  0xd3   :  { %v867_v31 = vmax.f32 %v773_v29, 0.0  ;;  %v748_v32 = vpop.f32.mrf.mxu0  ;;  %v785_v37 = vpop.f32.mrf.mxu3 }
  0xd4   :  { %v786_v52 = vadd.f32 %v785_v37, %v164_v49 }
  0xd5   :  { %v869_v35 = vpack.c.bf16 %v867_v31, %v867_v31 }
  0xd6   :  { %v798_v36 = vpop.f32.mrf.mxu2  ;;  %v761_v38 = vpop.f32.mrf.mxu1 }
  0xd7   :  { %1011 = vmatmul.bf16.vlgmr.msrb.gmra.mxu1 %v869_v35  ;;  %v799_v56 = vadd.f32 %v798_v36, %v786_v52 }
  0xdb   :  { %v787_v43 = vpop.f32.mrf.mxu3 }
  0xde   :  { %v800_v42 = vpop.f32.mrf.mxu2 }
  0xeb   :  { %v811_v47 = vpop.f32.mrf.mxu0 }
  0xec   :  { %v812_v57 = vadd.f32 %v811_v47, %v799_v56 }
  0xee   :  { %v824_v48 = vpop.f32.mrf.mxu1 }
  0xef   :  { %v825_v61 = vadd.f32 %v824_v48, %v812_v57 }
  0xf3   :  { %v837_v50 = vpop.f32.mrf.mxu3  ;;  %v813_v51 = vpop.f32.mrf.mxu0 }
  0xf4   :  { %v838_v62 = vadd.f32 %v837_v50, %v825_v61 }
  0xf6   :  { %v850_v53 = vpop.f32.mrf.mxu2  ;;  %v826_v54 = vpop.f32.mrf.mxu1 }
  0xf7   :  { %v851_v63 = vadd.f32 %v850_v53, %v838_v62 }
  0xfb   :  { %v839_v59 = vpop.f32.mrf.mxu3 }
  0xfe   :  { %v852_v60 = vpop.f32.mrf.mxu2 }
 0x106   :  { %v863_v0 = vpop.f32.mrf.mxu2 }
 0x107   :  { %v864_v1 = vadd.f32 %v863_v0, %v851_v63 }
 0x109   :  { %v868_v4 = vmax.f32 %v864_v1, 0.0 }
 0x10b   :  { %v870_v5 = vpack.c.bf16 %v868_v4, %v868_v4 }
 0x10d   :  { %1024 = vmatmul.bf16.vlgmr.msrb.gmra.mxu3 %v870_v5 }
 0x10e   :  { %v865_v6 = vpop.f32.mrf.mxu2 }
 0x154   :  { %v1012_v11 = vpop.f32.mrf.mxu1 }
 0x155   :  { %v1013_v3 = vadd.f32 %v1738_v46, %v1012_v11 }
 0x15c   :  { %v1014_v2 = vpop.f32.mrf.mxu1 }
 0x190   :  { %v1025_v13 = vpop.f32.mrf.mxu3 }
 0x191   :  { %v1026_v14 = vadd.f32 %v1025_v13, %v1013_v3 }
 0x193   :  { %v1029_v15 = vmax.f32 %v1026_v14, 0.0 }
 0x195   :  { %v1030_v58 = vpack.c.bf16 %v1029_v15, %v1029_v15 }
 0x197   :  { %1107 = vmatmul.bf16.vlgmr.msrb.gmra.mxu0 %v1030_v58 }
 0x198   :  { %v1027_v16 = vpop.f32.mrf.mxu3 }
 0x214   :  { %v1108_v18 = vpop.f32.mrf.mxu0 }
 0x215   :  { %v1109_v19 = vadd.f32 %v1739_v17, %v1108_v18 }
 0x217   :  { %v1112_v20 = vpack.c.bf16 %v1109_v19, %v1109_v19 }
 0x219   :  { %1113 = vst [vmem:[%s1929_s7] sm:$0xf] %v1112_v20 }
 0x21c   :  { %v1110_v21 = vpop.f32.mrf.mxu0 }
 0x21d   :  { %1118 = vsyncpa [#allocation3], 1 }
 0x21e   :  { %1119 = vsyncpa [#allocation5], 1 }

</bundles_post_ra>
